<compile_context>
chip_gen: v7x
topology: tpu7x:2x2x1
jax: 0.10.0
libtpu: 0.0.40
codegen_flags: <defaults>
</compile_context>

<pallas_src>
import functools
import math

import jax
import jax.numpy as jnp
from jax.experimental import pallas as pl
from jax.experimental.pallas import tpu as pltpu


def _margin_loss_kernel(x_ref, t_ref, *rest, margin, corr, n_rows, tn, has_weight):
    if has_weight:
        w_ref, o_num_ref, o_den_ref = rest
    else:
        o_num_ref, o_den_ref = rest

    i = pl.program_id(0)
    x = x_ref[...].astype(jnp.float32)                       # [TN, C]  cast on-chip
    t = t_ref[...]                                           # [TN, 1]  int32
    tn_b, c = x.shape

    col = jax.lax.broadcasted_iota(jnp.int32, (tn_b, c), 1)
    is_tgt = col == t                                        # [TN, C] one-hot mask

    # Stable log-softmax with the margin applied to the target logit only,
    # folded in as a scalar correction (corr = exp(-margin) - 1, a constant):
    #   lse(output) = max + log(sum_j exp(x_j - max) + exp(x_t - max) * corr)
    #   nll         = lse(output) - (x_t - margin)
    row_max = jnp.max(x, axis=1, keepdims=True)              # [TN, 1]
    sum_exp = jnp.sum(jnp.exp(x - row_max), axis=1, keepdims=True)
    x_t = jnp.sum(jnp.where(is_tgt, x, 0.0), axis=1, keepdims=True)
    st = x_t - row_max                                       # [TN, 1]
    lse = jnp.log(sum_exp + jnp.exp(st) * corr)              # [TN, 1]  (arg > 0)
    nll = lse - st + margin                                  # [TN, 1]

    # mask rows past the true batch size (partial last tile)
    row = jax.lax.broadcasted_iota(jnp.int32, (tn_b, 1), 0) + i * tn
    valid = row < n_rows

    if has_weight:
        w = w_ref[...].astype(jnp.float32)                   # [1, C] resident
        w_i = jnp.sum(jnp.where(is_tgt, w, 0.0), axis=1, keepdims=True)
        num = jnp.sum(jnp.where(valid, w_i * nll, 0.0), axis=0, keepdims=True)
        den = jnp.sum(jnp.where(valid, w_i, 0.0), axis=0, keepdims=True)
    else:
        num = jnp.sum(jnp.where(valid, nll, 0.0), axis=0, keepdims=True)
        den = jnp.sum(valid.astype(jnp.float32), axis=0, keepdims=True)

    # per-tile partial sums into this step's own lane-dense output block;
    # final reduce + divide happens in the wrapper (grid axis stays "parallel").
    o_num_ref[0] = jnp.broadcast_to(num, (1, 128))
    o_den_ref[0] = jnp.broadcast_to(den, (1, 128))


def _choose_rows(c_pad, itemsize, budget_bytes, pack):
    """Largest sublane-aligned row tile fitting the VMEM budget."""
    per_row = 2 * c_pad * itemsize      # double-buffered native logit tile
    per_row += 2 * c_pad * 4            # f32 working temporaries in the body
    per_row += 2 * 128 * 4              # lane-padded target tile, double-buffered
    slack = (2 << 20) + 2 * c_pad * 4   # resident weight row + misc headroom
    tn = (budget_bytes - slack) // per_row
    tn = max(pack, min(int(tn), 4096))
    return (tn // pack) * pack


def margin_loss(x, target, m=0.2, temperature=10.0, weight=None, block_rows=None):
    """Pallas TPU implementation of MarginLoss.forward. Returns a scalar."""
    n, c = x.shape
    itemsize = jnp.dtype(x.dtype).itemsize
    pack = max(8, 8 * (4 // max(1, itemsize)))   # 8 f32 / 16 bf16 / 32 int8

    # lane-dense class dim: pad logits with finfo.min (-> exp underflows to 0),
    # weights with 0; targets are always < c so padded lanes are never selected.
    c_pad = ((c + 127) // 128) * 128
    if c_pad != c:
        x = jnp.pad(x, ((0, 0), (0, c_pad - c)),
                    constant_values=float(jnp.finfo(x.dtype).min))
    t2d = target.reshape(n, 1).astype(jnp.int32)

    has_weight = weight is not None
    if has_weight:
        w2d = jnp.asarray(weight, jnp.float32).reshape(1, c)
        if c_pad != c:
            w2d = jnp.pad(w2d, ((0, 0), (0, c_pad - c)))

    # per-generation VMEM budget (v5e/v6e: 128 MiB phys -> 48 MiB; v7x: 64 -> 32)
    try:
        phys_vmem = int(pltpu.get_tpu_info().vmem_capacity_bytes)
    except Exception:
        phys_vmem = 64 << 20                       # conservative fallback
    budget = int(min(phys_vmem // 2, 48 << 20))

    if block_rows is not None:                     # explicit override (tests)
        tn = n if n <= block_rows else max(pack, (block_rows // pack) * pack)
    else:
        cap = _choose_rows(c_pad, itemsize, budget, pack)
        tn = n if n <= cap else cap
    grid_n = pl.cdiv(n, tn)

    margin = float(m) * float(temperature)
    kernel = functools.partial(
        _margin_loss_kernel,
        margin=margin, corr=math.exp(-margin) - 1.0,
        n_rows=n, tn=tn, has_weight=has_weight)

    in_specs = [pl.BlockSpec((tn, c_pad), lambda i: (i, 0)),   # logits (native dtype)
                pl.BlockSpec((tn, 1), lambda i: (i, 0))]       # targets
    args = [x, t2d]
    if has_weight:
        in_specs.append(pl.BlockSpec((1, c_pad), lambda i: (0, 0)))  # resident weights
        args.append(w2d)

    out_shape = (jax.ShapeDtypeStruct((grid_n, 1, 128), jnp.float32),
                 jax.ShapeDtypeStruct((grid_n, 1, 128), jnp.float32))
    out_specs = (pl.BlockSpec((1, 1, 128), lambda i: (i, 0, 0)),
                 pl.BlockSpec((1, 1, 128), lambda i: (i, 0, 0)))

    cost = pl.CostEstimate(
        flops=int(8 * n * c_pad),
        transcendentals=int(n * c_pad),
        bytes_accessed=int(n * c_pad * itemsize + n * 4
                           + (c_pad * 4 if has_weight else 0)
                           + grid_n * 2 * 128 * 4))

    part_num, part_den = pl.pallas_call(
        kernel,
        out_shape=out_shape,
        grid=(grid_n,),
        in_specs=in_specs,
        out_specs=out_specs,
        compiler_params=pltpu.CompilerParams(
            dimension_semantics=("parallel",),
            vmem_limit_bytes=budget),
        cost_estimate=cost,
    )(*args)

    # tiny final reduce + exact divide (NaN/Inf if sum(w_i)==0, same as torch)
    return jnp.sum(part_num[:, 0, 0]) / jnp.sum(part_den[:, 0, 0])


def _margin_loss_ref(x, target, m=0.2, temperature=10.0, weight=None):
    """Plain-JAX reference for sanity checking."""
    n, c = x.shape
    onehot = jax.nn.one_hot(target, c, dtype=bool)
    xf = x.astype(jnp.float32)
    out = jnp.where(onehot, xf - m * temperature, xf)
    logp = jax.nn.log_softmax(out, axis=1)
    nll = -jnp.sum(jnp.where(onehot, logp, 0.0), axis=1)
    if weight is None:
        return jnp.mean(nll)
    w_i = jnp.asarray(weight, jnp.float32)[target]
    return jnp.sum(w_i * nll) / jnp.sum(w_i)


if __name__ == "__main__":
    key = jax.random.PRNGKey(0)
    kx, kt, kw, kx2, kt2 = jax.random.split(key, 5)

    # small shapes consistent with the module: batch=8 logits over 32 classes
    N, C = 8, 32
    x = jax.random.normal(kx, (N, C), dtype=jnp.float32) * 3.0
    target = jax.random.randint(kt, (N,), 0, C, dtype=jnp.int32)

    loss = jax.block_until_ready(margin_loss(x, target, m=0.2, temperature=10.0))
    ref = _margin_loss_ref(x, target, m=0.2, temperature=10.0)
    assert jnp.allclose(loss, ref, atol=1e-4, rtol=1e-4), (loss, ref)

    # weighted cross-entropy variant
    wgt = jax.random.uniform(kw, (C,), dtype=jnp.float32) + 0.5
    loss_w = jax.block_until_ready(margin_loss(x, target, weight=wgt))
    ref_w = _margin_loss_ref(x, target, weight=wgt)
    assert jnp.allclose(loss_w, ref_w, atol=1e-4, rtol=1e-4), (loss_w, ref_w)

    # multi-tile path with a partial last tile (per-tile partials + row masking)
    N2 = 37
    x2 = jax.random.normal(kx2, (N2, C), dtype=jnp.float32) * 3.0
    t2 = jax.random.randint(kt2, (N2,), 0, C, dtype=jnp.int32)
    loss2 = jax.block_until_ready(margin_loss(x2, t2, block_rows=8))
    ref2 = _margin_loss_ref(x2, t2)
    assert jnp.allclose(loss2, ref2, atol=1e-4, rtol=1e-4), (loss2, ref2)

    # bf16 logits, non-aligned N, multi-tile (review correctness concern)
    x3 = x2.astype(jnp.bfloat16)
    loss3 = jax.block_until_ready(margin_loss(x3, t2, block_rows=16))
    ref3 = _margin_loss_ref(x3, t2)
    assert jnp.allclose(loss3, ref3, atol=5e-3, rtol=5e-3), (loss3, ref3)

    print("KERNEL_OK")
</pallas_src>

<mosaic_0001>
module attributes {stable_mosaic.version = 11 : i64} {
  func.func @_margin_loss_kernel(%arg0: i32, %arg1: memref<8x128xf32, #tpu.memory_space<vmem>>, %arg2: memref<8x1xi32, #tpu.memory_space<vmem>>, %arg3: memref<1x1x128xf32, #tpu.memory_space<vmem>>, %arg4: memref<1x1x128xf32, #tpu.memory_space<vmem>>) attributes {dimension_semantics = [#tpu.dimension_semantics<parallel>], iteration_bounds = array<i64: 1>, scalar_prefetch = 0 : i64, scratch_operands = 0 : i64, tpu.core_type = #tpu.core_type<tc>, window_params = [{transform_indices = @transform_0, window_bounds = array<i64: 8, 128>}, {transform_indices = @transform_1, window_bounds = array<i64: 8, 1>}, {transform_indices = @transform_2, window_bounds = array<i64: 1, 1, 128>}, {transform_indices = @transform_3, window_bounds = array<i64: 1, 1, 128>}]} {
    %c0 = arith.constant 0 : index
    %c0_0 = arith.constant 0 : index
    %0 = vector.load %arg1[%c0, %c0_0] : memref<8x128xf32, #tpu.memory_space<vmem>>, vector<8x128xf32>
    %c0_1 = arith.constant 0 : index
    %c0_2 = arith.constant 0 : index
    %1 = vector.load %arg2[%c0_1, %c0_2] : memref<8x1xi32, #tpu.memory_space<vmem>>, vector<8x1xi32>
    %2 = tpu.iota {dimensions = array<i32: 1>} : vector<8x128xi32>
    %3 = vector.broadcast %1 : vector<8x1xi32> to vector<8x128xi32>
    %4 = arith.cmpi eq, %2, %3 : vector<8x128xi32>
    %cst = arith.constant dense<0xFF800000> : vector<8xf32>
    %5 = vector.multi_reduction <maximumf>, %0, %cst [1] : vector<8x128xf32> to vector<8xf32>
    %6 = vector.shape_cast %5 : vector<8xf32> to vector<8x1xf32>
    %7 = vector.broadcast %6 : vector<8x1xf32> to vector<8x128xf32>
    %8 = arith.subf %0, %7 : vector<8x128xf32>
    %9 = math.exp %8 : vector<8x128xf32>
    %cst_3 = arith.constant dense<0.000000e+00> : vector<8xf32>
    %10 = vector.multi_reduction <add>, %9, %cst_3 [1] : vector<8x128xf32> to vector<8xf32>
    %11 = vector.shape_cast %10 : vector<8xf32> to vector<8x1xf32>
    %cst_4 = arith.constant 0.000000e+00 : f32
    %12 = vector.broadcast %cst_4 : f32 to vector<8x128xf32>
    %13 = arith.select %4, %0, %12 : vector<8x128xi1>, vector<8x128xf32>
    %cst_5 = arith.constant dense<0.000000e+00> : vector<8xf32>
    %14 = vector.multi_reduction <add>, %13, %cst_5 [1] : vector<8x128xf32> to vector<8xf32>
    %15 = vector.shape_cast %14 : vector<8xf32> to vector<8x1xf32>
    %16 = arith.subf %15, %6 : vector<8x1xf32>
    %17 = math.exp %16 : vector<8x1xf32>
    %cst_6 = arith.constant -0.864664733 : f32
    %18 = vector.broadcast %cst_6 : f32 to vector<8x1xf32>
    %19 = arith.mulf %17, %18 : vector<8x1xf32>
    %20 = arith.addf %11, %19 : vector<8x1xf32>
    %21 = math.log %20 : vector<8x1xf32>
    %22 = arith.subf %21, %16 : vector<8x1xf32>
    %cst_7 = arith.constant 2.000000e+00 : f32
    %23 = vector.broadcast %cst_7 : f32 to vector<8x1xf32>
    %24 = arith.addf %22, %23 : vector<8x1xf32>
    %25 = tpu.iota {dimensions = array<i32: 0>} : vector<8x1xi32>
    %c8_i32 = arith.constant 8 : i32
    %26 = arith.muli %arg0, %c8_i32 : i32
    %27 = vector.broadcast %26 : i32 to vector<8x1xi32>
    %28 = arith.addi %25, %27 : vector<8x1xi32>
    %c8_i32_8 = arith.constant 8 : i32
    %29 = vector.broadcast %c8_i32_8 : i32 to vector<8x1xi32>
    %30 = arith.cmpi slt, %28, %29 : vector<8x1xi32>
    %cst_9 = arith.constant 0.000000e+00 : f32
    %31 = vector.broadcast %cst_9 : f32 to vector<8x1xf32>
    %32 = arith.select %30, %24, %31 : vector<8x1xi1>, vector<8x1xf32>
    %cst_10 = arith.constant dense<0.000000e+00> : vector<1xf32>
    %33 = vector.multi_reduction <add>, %32, %cst_10 [0] : vector<8x1xf32> to vector<1xf32>
    %34 = vector.shape_cast %33 : vector<1xf32> to vector<1x1xf32>
    %35 = arith.extui %30 : vector<8x1xi1> to vector<8x1xi32>
    %36 = arith.sitofp %35 : vector<8x1xi32> to vector<8x1xf32>
    %cst_11 = arith.constant dense<0.000000e+00> : vector<1xf32>
    %37 = vector.multi_reduction <add>, %36, %cst_11 [0] : vector<8x1xf32> to vector<1xf32>
    %38 = vector.shape_cast %37 : vector<1xf32> to vector<1x1xf32>
    %39 = vector.shape_cast %34 : vector<1x1xf32> to vector<1x1xf32>
    %40 = vector.broadcast %39 : vector<1x1xf32> to vector<1x128xf32>
    %c0_12 = arith.constant 0 : index
    %c0_13 = arith.constant 0 : index
    %c0_14 = arith.constant 0 : index
    %41 = vector.load %arg3[%c0_12, %c0_13, %c0_14] : memref<1x1x128xf32, #tpu.memory_space<vmem>>, vector<1x1x128xf32>
    %42 = vector.shape_cast %41 : vector<1x1x128xf32> to vector<1x128xf32>
    %43 = vector.shape_cast %40 : vector<1x128xf32> to vector<1x1x128xf32>
    tpu.vector_store %arg3[%c0_12, %c0_13, %c0_14], %43 {strides = array<i32>} : memref<1x1x128xf32, #tpu.memory_space<vmem>>, vector<1x1x128xf32>,
    %44 = vector.shape_cast %38 : vector<1x1xf32> to vector<1x1xf32>
    %45 = vector.broadcast %44 : vector<1x1xf32> to vector<1x128xf32>
    %c0_15 = arith.constant 0 : index
    %c0_16 = arith.constant 0 : index
    %c0_17 = arith.constant 0 : index
    %46 = vector.load %arg4[%c0_15, %c0_16, %c0_17] : memref<1x1x128xf32, #tpu.memory_space<vmem>>, vector<1x1x128xf32>
    %47 = vector.shape_cast %46 : vector<1x1x128xf32> to vector<1x128xf32>
    %48 = vector.shape_cast %45 : vector<1x128xf32> to vector<1x1x128xf32>
    tpu.vector_store %arg4[%c0_15, %c0_16, %c0_17], %48 {strides = array<i32>} : memref<1x1x128xf32, #tpu.memory_space<vmem>>, vector<1x1x128xf32>,
    return
  }
  func.func @transform_0(%arg0: i32) -> (i32, i32) {
    %c0_i32 = arith.constant 0 : i32
    %c0_i32_0 = arith.constant 0 : i32
    return %arg0, %c0_i32 : i32, i32
  }
  func.func @transform_1(%arg0: i32) -> (i32, i32) {
    %c0_i32 = arith.constant 0 : i32
    %c0_i32_0 = arith.constant 0 : i32
    return %arg0, %c0_i32 : i32, i32
  }
  func.func @transform_2(%arg0: i32) -> (i32, i32, i32) {
    %c0_i32 = arith.constant 0 : i32
    %c0_i32_0 = arith.constant 0 : i32
    %c0_i32_1 = arith.constant 0 : i32
    return %arg0, %c0_i32, %c0_i32_0 : i32, i32, i32
  }
  func.func @transform_3(%arg0: i32) -> (i32, i32, i32) {
    %c0_i32 = arith.constant 0 : i32
    %c0_i32_0 = arith.constant 0 : i32
    %c0_i32_1 = arith.constant 0 : i32
    return %arg0, %c0_i32, %c0_i32_0 : i32, i32, i32
  }
}

</mosaic_0001>

<bundles_post_ra>
// kernel: tpu_custom_call.1
= control target key start
LH: loop header
LB: loop body
LE: loop exit
PB: predicated region body
PF: predicated region fallthrough
CT: control target
= control target key end

     0   :  { %9 = vsyncpa [#allocation3], 0  ;;  %s206_s0 = inlined_call_operand.vmem [shape: f32[8,128], index: 0, kind: input, shape index: {}]   ;;  %s207_s1 = inlined_call_operand.vmem [shape: s32[8,1], index: 1, kind: input, shape index: {}]   ;;  %s208_s2 = inlined_call_operand.hbm [shape: f32[1,1,128], index: 2, kind: output, shape index: {0}]   ;;  %s209_s3 = inlined_call_operand.hbm [shape: f32[1,1,128], index: 3, kind: output, shape index: {1}]  }
   0x1   :  { %v15_v0 = vld [vmem:[%s206_s0] sm:$0xff] }
   0x2   :  { %10 = vsyncpa [#allocation5], 0  ;;  %23 = vmax.xlane.f32.xlu0 %v15_v0  ;;  %v152_v1 = vmov 0   ;;  %v16_v2 = vld [vmem:[%s207_s1] sm:$0xff]  ;;  %v17_v5 = vlaneseq  ;;  %v153_v11 = vmov 1.0   ;;  %s154_s0 = smov [#allocation4]  }
   0x3   :  { %97 = vset.pattern.permute.xlu0 %v152_v1  ;;  %v57_v12 = vrot.slane %v153_v11, 4  ;;  %s81_s1 = sshll.u32 %s154_s0, 4  ;;  %s82_s1 = int_to_ptr.vmem [resolvable:$true] %s81_s1 }
   0x4   :  { %v18_v7 = vand.u32 127, %v17_v5  ;;  %s104_s16 = scalar_lea.vmem %s82_s1, 16  ;;  %s108_s17 = scalar_lea.vmem %s82_s1, 32 }
   0x5   :  { %v58_v13 = vadd.f32 1.0, %v57_v12  ;;  %p105_p0 = scmp.ne.s32.totalorder %s82_s1, %s104_s16  ;;  %p109_p1 = scmp.lt.s32.totalorder %s82_s1, %s82_s1 }
   0x6   :  { %p110_p2 = scmp.lt.s32.totalorder %s108_s17, %s104_s16 }
   0x7   :  { %v59_v14 = vrot.slane %v58_v13, 2 }
   0x8   :  { %p111_p3 = por %p110_p2, %p109_p1 }
   0x9   :  { %v60_v15 = vadd.f32 %v59_v14, %v58_v13 }
   0xa   :  { %p112_p4 = pnand %p111_p3, %p105_p0 }
   0xb   :  { %v61_v16 = vrot.slane %v60_v15, 1 }
   0xd   :  { %v62_v17 = vadd.f32 %v61_v16, %v60_v15 }
   0xf   :  { %64 = vst [vmem:[#allocation4] sm:$0x1] %v62_v17 }
  0x18   :  { %20 = vperm.xlu0 %97, %v16_v2  }
  0x8f   :  { %v24_v3 = vpop.xlane.xlu0 %23 }
  0x90   :  { %v25_v4 = vsub.f32 %v15_v0, %v24_v3 }
  0x92   :  { %v26_v6 = vmul.f32 1.442695, %v25_v4 }
  0x94   :  { %98 = vpow2.f32 %v26_v6 }
  0x97   :  { %v21_v8 = vpop.permute.xlu0 %20 }
  0x98   :  { %vm22_vm0 = vcmp.eq.s32.totalorder %v18_v7, %v21_v8 }
  0x99   :  { %v30_v9 = vsel %vm22_vm0, %v15_v0, 0.0 }
  0x9a   :  { %31 = vadd.xlane.f32.xlu1 %v30_v9 }
  0x9e   :  { %v99_v10 = vpop.eup %98 }
  0x9f   :  { %28 = vadd.xlane.f32.xlu1 %v99_v10 }
  0xa0   :  { %115 = shalt.err (!%p112_p4)
}
  0xa1   :  { %s116_s20 = scalar_lea.hbm %s209_s3, 16 }
  0xa2   :  { %p117_p5 = scmp.ne.s32.totalorder %s209_s3, %s116_s20  ;;  %p120_p6 = scmp.lt.u32.totalorder %s116_s20, %s209_s3 }
  0xa4   :  { %p122_p7 = pnand %p120_p6, %p117_p5 }
  0xa6   :  { %125 = shalt.err (!%p122_p7)
}
  0xa7   :  { %84 = dma.vmem_to_hbm [thread:$0]  %s82_s1, 16, %s209_s3, [#allocation5]  }
  0xa8   :  { %s155_s27 = smov [#allocation2]  }
  0xa9   :  { %s71_s28 = sshll.u32 %s155_s27, 4  ;;  %s72_s28 = int_to_ptr.vmem [resolvable:$true] %s71_s28 }
  0xaa   :  { %s126_s3 = scalar_lea.vmem %s72_s28, 16  ;;  %s130_s29 = scalar_lea.vmem %s72_s28, 32 }
  0xab   :  { %p127_p8 = scmp.ne.s32.totalorder %s72_s28, %s126_s3  ;;  %p131_p9 = scmp.lt.s32.totalorder %s72_s28, %s72_s28 }
  0xac   :  { %p132_p10 = scmp.lt.s32.totalorder %s130_s29, %s126_s3 }
  0xae   :  { %p133_p11 = por %p132_p10, %p131_p9 }
  0xb0   :  { %p134_p12 = pnand %p133_p11, %p127_p8 }
 0x127   :  { %v32_v18 = vpop.xlane.xlu1 %31 }
 0x128   :  { %v33_v19 = vsub.f32 %v32_v18, %v24_v3 }
 0x12a   :  { %v34_v20 = vmul.f32 1.442695, %v33_v19 }
 0x12c   :  { %100 = vpow2.f32 %v34_v20  ;;  %v29_v23 = vpop.xlane.xlu1 %28 }
 0x136   :  { %v101_v21 = vpop.eup %100 }
 0x137   :  { %v36_v22 = vmul.f32 -0.86466473, %v101_v21 }
 0x139   :  { %v37_v24 = vadd.f32 %v36_v22, %v29_v23 }
 0x13b   :  { %102 = vlog2.f32 %v37_v24 }
 0x145   :  { %v103_v25 = vpop.eup %102 }
 0x146   :  { %v39_v26 = vmul.f32 0.6931472, %v103_v25 }
 0x148   :  { %v40_v27 = vsub.f32 %v39_v26, %v33_v19 }
 0x14a   :  { %v41_v28 = vadd.f32 2.0, %v40_v27 }
 0x14c   :  { %v49_v29 = vrot.slane %v41_v28, 4 }
 0x14e   :  { %v50_v30 = vadd.f32 %v49_v29, %v41_v28 }
 0x150   :  { %v51_v31 = vrot.slane %v50_v30, 2 }
 0x152   :  { %v52_v32 = vadd.f32 %v51_v31, %v50_v30 }
 0x154   :  { %v53_v33 = vrot.slane %v52_v32, 1 }
 0x156   :  { %v54_v34 = vadd.f32 %v53_v33, %v52_v32 }
 0x158   :  { %63 = vst [vmem:[#allocation2] sm:$0x1] %v54_v34 }
 0x159   :  { %137 = shalt.err (!%p134_p12)
}
 0x15a   :  { %s138_s5 = scalar_lea.hbm %s208_s2, 16 }
 0x15b   :  { %p139_p13 = scmp.ne.s32.totalorder %s208_s2, %s138_s5  ;;  %p142_p0 = scmp.lt.u32.totalorder %s138_s5, %s208_s2 }
 0x15d   :  { %p144_p1 = pnand %p142_p0, %p139_p13 }
 0x15f   :  { %147 = shalt.err (!%p144_p1)
}
 0x160   :  { %74 = dma.vmem_to_hbm [thread:$0]  %s72_s28, 16, %s208_s2, [#allocation3]  }
 0x161   :  { %148 = dma.done.wait [#allocation3], 16  }
 0x162   :  { %149 = vsyncadd [#allocation3], 4294967280 }
 0x163   :  { %150 = dma.done.wait [#allocation5], 16  }
 0x164   :  { %151 = vsyncadd [#allocation5], 4294967280 }
 0x165   :  { %91 = vsyncpa [#allocation3], 1 }
 0x166   :  { %92 = vsyncpa [#allocation5], 1 }

</bundles_post_ra>
